<compile_context>
chip_gen: v7x
topology: tpu7x:2x2x1
jax: 0.10.0
libtpu: 0.0.40
codegen_flags: <defaults>
</compile_context>

<pallas_src>
import jax
import jax.numpy as jnp
from jax.experimental import pallas as pl
from jax.experimental.pallas import tpu as pltpu


def _cdiv(a: int, b: int) -> int:
    return -(-a // b)


def _round_up(x: int, m: int) -> int:
    return _cdiv(x, m) * m


def _vmem_capacity_bytes() -> int:
    try:
        return int(pltpu.get_tpu_info().vmem_capacity_bytes)
    except Exception:
        return 64 * 2 ** 20  # conservative (v7x-sized) fallback


def _balanced_tile(size: int, granule: int, max_tile: int) -> int:
    """Tile = multiple of `granule`, <= ~max_tile, splitting `size` with minimal
    remainder waste (balanced split). Falls back to the full dim when size < granule
    (legal: block dim equal to the array dim)."""
    if size <= granule:
        return size
    g = _cdiv(size, granule)              # granules needed to cover `size`
    gmax = max(1, max_tile // granule)    # granules per tile cap
    n_tiles = _cdiv(g, gmax)
    per = _cdiv(g, n_tiles)
    return per * granule


def _heron_kernel(a2_ref, b2_ref, c2_ref, out_ref):
    """Blocks: (tile_n, tile_l) f32 squared side lengths -> (tile_n, tile_l) distances."""
    a2 = a2_ref[...]   # |p1 - p2|^2
    b2 = b2_ref[...]   # |p2 - p3|^2  (the line segment)
    c2 = c2_ref[...]   # |p1 - p3|^2

    # Heron in squared-length form: 16*area^2 = 4*a2*b2 - (a2 + b2 - c2)^2
    t = a2 + b2 - c2
    area16 = jnp.maximum(4.0 * a2 * b2 - t * t, 0.0)   # fp-noise negative -> 0 (== NaN fixup)

    inv_b2 = pl.reciprocal(b2, approx=True)            # EUP slot, effectively free
    dist = 0.5 * jnp.sqrt(area16 * inv_b2)             # = 2*area / b

    # fix_nan()/zero_filled(): degenerate line (b2 == 0) -> 0.  Keep the select (not
    # arithmetic masking): padded/edge lanes may compute 0*inf -> NaN in the true branch.
    out_ref[...] = jnp.where(b2 > 0.0, dist, 0.0)


def point_line_distance(p1s, p2s, p3s):
    """p1s, p2s, p3s: (Points, Batch, Len, Dims) arrays.
    Returns distances of shape (Points, Batch, Len), float32."""
    P, B, L, D = p1s.shape
    N = P * B
    f32 = jnp.float32

    p1 = p1s.astype(f32).reshape(N, L, D)
    p2 = p2s.astype(f32).reshape(N, L, D)
    p3 = p3s.astype(f32).reshape(N, L, D)

    # Reduce the tiny D axis up front -> three lane-dense (N, L) planes.  With
    # allow_input_fusion below, XLA fuses these reductions into the pallas_call
    # operands so the planes are not materialized in HBM.
    d12 = p1 - p2
    d23 = p2 - p3
    d13 = p1 - p3
    a2 = jnp.sum(d12 * d12, axis=-1)
    b2 = jnp.sum(d23 * d23, axis=-1)
    c2 = jnp.sum(d13 * d13, axis=-1)

    # --- Generation-aware, balanced tiling -------------------------------------------
    vmem_cap = _vmem_capacity_bytes()
    if vmem_cap >= 100 * 2 ** 20:          # 128 MiB parts (v5e / v6e): bigger blocks
        max_block_elems = 2 * 1024 * 1024  # 8 MiB per f32 block
    else:                                  # 64 MiB parts (v7x): keep blocks <= ~4 MiB
        max_block_elems = 1 * 1024 * 1024

    tile_l = _balanced_tile(L, 128, 2048)
    max_tile_n = max(8, (max_block_elems // max(tile_l, 1)) // 8 * 8)
    tile_n = _balanced_tile(N, 8, max_tile_n)

    # Make sure the parallel grid has >= 2 steps when possible (v7x has 2 TensorCores).
    if _cdiv(N, tile_n) * _cdiv(L, tile_l) < 2:
        if N >= 16:
            tile_n = _round_up(_cdiv(N, 2), 8)
        elif L >= 256:
            tile_l = _round_up(_cdiv(L, 2), 128)

    grid = (_cdiv(N, tile_n), _cdiv(L, tile_l))
    blk = pl.BlockSpec((tile_n, tile_l), lambda i, j: (i, j))

    # VMEM budget: (3 inputs + 1 output) blocks, f32, double-buffered.
    vmem_need = 4 * tile_n * tile_l * 4 * 2
    vmem_limit = int(min(0.75 * vmem_cap, max(32 * 2 ** 20, 2 * vmem_need)))

    out = pl.pallas_call(
        _heron_kernel,
        out_shape=jax.ShapeDtypeStruct((N, L), f32),   # exact shape: no pad, no epilogue slice
        grid_spec=pltpu.PrefetchScalarGridSpec(
            num_scalar_prefetch=0,
            grid=grid,
            in_specs=[blk, blk, blk],
            out_specs=blk,
        ),
        compiler_params=pltpu.CompilerParams(
            dimension_semantics=("parallel", "parallel"),
            vmem_limit_bytes=vmem_limit,
            allow_input_fusion=[True, True, True],     # fuse the D-reduction into the operands
        ),
    )(a2, b2, c2)

    return out.reshape(P, B, L)


def _reference(p1s, p2s, p3s):
    # Pure-JAX mirror of the PyTorch forward (all-valid masks).
    def dist(x, y):
        return jnp.sqrt(jnp.sum((x - y) ** 2, axis=-1))

    a = dist(p1s, p2s)
    b = dist(p2s, p3s)
    c = dist(p1s, p3s)
    s = (a + b + c) / 2
    squared = s * (s - a) * (s - b) * (s - c)
    area = jnp.sqrt(squared)
    d = (area * 2) / b
    return jnp.where(jnp.isnan(d), 0.0, d)


if __name__ == "__main__":
    # Small shapes consistent with the forward: (Points, Batch, Len, Dims)
    P, B, L, D = 8, 2, 128, 3
    key = jax.random.PRNGKey(0)
    k1, k2, k3 = jax.random.split(key, 3)
    p1s = jax.random.normal(k1, (P, B, L, D), dtype=jnp.float32)
    p2s = jax.random.normal(k2, (P, B, L, D), dtype=jnp.float32)
    p3s = jax.random.normal(k3, (P, B, L, D), dtype=jnp.float32)

    fn = jax.jit(point_line_distance)
    out = jax.block_until_ready(fn(p1s, p2s, p3s))
    ref = _reference(p1s, p2s, p3s)
    assert out.shape == (P, B, L)
    # Squared-length Heron + approx reciprocal is not bit-identical to the sqrt-based
    # torch formulation; compare with a loose-but-meaningful tolerance.
    assert jnp.allclose(out, ref, atol=5e-3, rtol=5e-3), "mismatch vs reference (aligned)"

    # Non-(8,128)-aligned shape: exercises the pad-free edge-masking path.
    P2, B2, L2 = 5, 2, 200
    q1 = jax.random.normal(k1, (P2, B2, L2, D), dtype=jnp.float32)
    q2 = jax.random.normal(k2, (P2, B2, L2, D), dtype=jnp.float32)
    q3 = jax.random.normal(k3, (P2, B2, L2, D), dtype=jnp.float32)
    out2 = jax.block_until_ready(jax.jit(point_line_distance)(q1, q2, q3))
    ref2 = _reference(q1, q2, q3)
    assert out2.shape == (P2, B2, L2)
    assert jnp.allclose(out2, ref2, atol=5e-3, rtol=5e-3), "mismatch vs reference (ragged)"

    print("KERNEL_OK")
</pallas_src>

<mosaic_0001>
module attributes {stable_mosaic.version = 11 : i64} {
  func.func @_heron_kernel(%arg0: i32, %arg1: i32, %arg2: memref<8x128xf32, #tpu.memory_space<vmem>>, %arg3: memref<8x128xf32, #tpu.memory_space<vmem>>, %arg4: memref<8x128xf32, #tpu.memory_space<vmem>>, %arg5: memref<8x128xf32, #tpu.memory_space<vmem>>) attributes {dimension_semantics = [#tpu.dimension_semantics<parallel>, #tpu.dimension_semantics<parallel>], iteration_bounds = array<i64: 2, 1>, scalar_prefetch = 0 : i64, scratch_operands = 0 : i64, tpu.core_type = #tpu.core_type<tc>, window_params = [{transform_indices = @transform_0, window_bounds = array<i64: 8, 128>}, {transform_indices = @transform_1, window_bounds = array<i64: 8, 128>}, {transform_indices = @transform_2, window_bounds = array<i64: 8, 128>}, {transform_indices = @transform_3, window_bounds = array<i64: 8, 128>}]} {
    %c0 = arith.constant 0 : index
    %c0_0 = arith.constant 0 : index
    %0 = vector.load %arg2[%c0, %c0_0] : memref<8x128xf32, #tpu.memory_space<vmem>>, vector<8x128xf32>
    %c0_1 = arith.constant 0 : index
    %c0_2 = arith.constant 0 : index
    %1 = vector.load %arg3[%c0_1, %c0_2] : memref<8x128xf32, #tpu.memory_space<vmem>>, vector<8x128xf32>
    %c0_3 = arith.constant 0 : index
    %c0_4 = arith.constant 0 : index
    %2 = vector.load %arg4[%c0_3, %c0_4] : memref<8x128xf32, #tpu.memory_space<vmem>>, vector<8x128xf32>
    %3 = arith.addf %0, %1 : vector<8x128xf32>
    %4 = arith.subf %3, %2 : vector<8x128xf32>
    %cst = arith.constant 4.000000e+00 : f32
    %5 = vector.broadcast %cst : f32 to vector<8x128xf32>
    %6 = arith.mulf %5, %0 : vector<8x128xf32>
    %7 = arith.mulf %6, %1 : vector<8x128xf32>
    %8 = arith.mulf %4, %4 : vector<8x128xf32>
    %9 = arith.subf %7, %8 : vector<8x128xf32>
    %cst_5 = arith.constant 0.000000e+00 : f32
    %10 = vector.broadcast %cst_5 : f32 to vector<8x128xf32>
    %11 = arith.maximumf %9, %10 : vector<8x128xf32>
    %12 = tpu.reciprocal %1 {approx = true} : vector<8x128xf32> -> vector<8x128xf32>
    %13 = arith.mulf %11, %12 : vector<8x128xf32>
    %14 = math.sqrt %13 : vector<8x128xf32>
    %cst_6 = arith.constant 5.000000e-01 : f32
    %15 = vector.broadcast %cst_6 : f32 to vector<8x128xf32>
    %16 = arith.mulf %15, %14 : vector<8x128xf32>
    %cst_7 = arith.constant 0.000000e+00 : f32
    %17 = vector.broadcast %cst_7 : f32 to vector<8x128xf32>
    %18 = arith.cmpf ogt, %1, %17 : vector<8x128xf32>
    %cst_8 = arith.constant 0.000000e+00 : f32
    %19 = vector.broadcast %cst_8 : f32 to vector<8x128xf32>
    %20 = arith.select %18, %16, %19 : vector<8x128xi1>, vector<8x128xf32>
    %c0_9 = arith.constant 0 : index
    %c0_10 = arith.constant 0 : index
    %21 = vector.load %arg5[%c0_9, %c0_10] : memref<8x128xf32, #tpu.memory_space<vmem>>, vector<8x128xf32>
    tpu.vector_store %arg5[%c0_9, %c0_10], %20 {strides = array<i32>} : memref<8x128xf32, #tpu.memory_space<vmem>>, vector<8x128xf32>,
    return
  }
  func.func @transform_0(%arg0: i32, %arg1: i32) -> (i32, i32) {
    %c0_i32 = arith.constant 0 : i32
    return %arg0, %arg1 : i32, i32
  }
  func.func @transform_1(%arg0: i32, %arg1: i32) -> (i32, i32) {
    %c0_i32 = arith.constant 0 : i32
    return %arg0, %arg1 : i32, i32
  }
  func.func @transform_2(%arg0: i32, %arg1: i32) -> (i32, i32) {
    %c0_i32 = arith.constant 0 : i32
    return %arg0, %arg1 : i32, i32
  }
  func.func @transform_3(%arg0: i32, %arg1: i32) -> (i32, i32) {
    %c0_i32 = arith.constant 0 : i32
    return %arg0, %arg1 : i32, i32
  }
}

</mosaic_0001>

<bundles_post_ra>
// kernel: point_line_distance.1
= control target key start
LH: loop header
LB: loop body
LE: loop exit
PB: predicated region body
PF: predicated region fallthrough
CT: control target
= control target key end

     0   :  { %8 = vsyncpa [#allocation3], 0  ;;  %s677_s0 = inlined_call_operand.vmem [shape: f32[16,128], index: 0, kind: input, shape index: {}]   ;;  %s678_s1 = inlined_call_operand.vmem [shape: f32[16,128], index: 1, kind: input, shape index: {}]   ;;  %s679_s2 = inlined_call_operand.vmem [shape: f32[16,128], index: 2, kind: input, shape index: {}]   ;;  %s680_s3 = inlined_call_operand.hbm [shape: f32[16,128], index: 3, kind: output, shape index: {}]  }
   0x1   :  { %10 = vsyncpa [#allocation3 + $0x1], 0  ;;  %s559_s12 = smov 0   ;;  %s561_s13 = smov 0  }
   0x2   :  { %s563_s14 = smov 0   ;;  %s565_s15 = smov 0  }
   0x3   :  { %s567_s16 = smov 0   ;;  %s569_s17 = smov 0  }
   0x4 LB: > { %s386_s18 = sadd.s32 4294967295, %s536_s17   ;;  %s387_s19 = sadd.s32 4294967294, %s536_s17   ;;  %s536_s17 = sphi %s569_s17, %s16_s17   ;;  %s532_s16 = sphi %s567_s16, %s687_s16   ;;  %s528_s15 = sphi %s565_s15, %s686_s15   ;;  %s524_s14 = sphi %s563_s14, %s685_s14   ;;  %s520_s13 = sphi %s561_s13, %s684_s13   ;;  %s516_s12 = sphi %s559_s12, %s683_s12  }
   0x5   : > { %s28_s20 = sadd.s32 1, %s532_s16  ;;  %s121_s21 = sadd.s32 1, %s524_s14 }
   0x6   : > { %p30_p0 = scmp.ge.s32.totalorder %s28_s20, 2  ;;  %p131_p1 = scmp.ne.s32.totalorder %s524_s14, %s520_s13 }
   0x7   : > { %p132_p2 = scmp.eq.s32.totalorder %s386_s18, 1  ;;  %p137_p3 = scmp.ne.s32.totalorder %s520_s13, %s516_s12 }
   0x8   : > { %s689_s20 = smov (%p30_p0, %s28_s20), 0  ;;  %p138_p5 = scmp.eq.s32.totalorder %s387_s19, 1 }
   0x9   : > { %p599_p4 = por %p132_p2, %p131_p1  ;;  %s116_s23 = ssub.s32 %s532_s16, %s689_s20 }
   0xa   : > { %p390_p6 = scmp.ge.s32.totalorder %s536_s17, 1  ;;  %p119_p7 = scmp.eq.s32.totalorder %s116_s23, 0 }
   0xb   : > { %p606_p8 = por %p138_p5, %p137_p3  ;;  %p186_p9 = scmp.lt.s32.totalorder %s536_s17, 3 }
   0xc   : > { %s612_s25 = scalar_select %p119_p7, %s524_s14, %s121_s21  }
   0xd   : > { %p187_p10 = pnand %p390_p6, %p186_p9 }
   0xe   : > { %p226_p11 = scmp.lt.s32.totalorder (!%p187_p10), %s528_s15, 1  ;;  %s223_s10 = sand.u32 (!%p187_p10), 1, %s520_s13  }
   0xf   : > { %190 = sbr.rel (%p187_p10) target bundleno = 73 (0x49), region = 32  ;;  %s391_s11 = sshll.u32 (!%p187_p10), %s223_s10, 3 }
  0x10   : > { %s225_s18 = scalar_lea.vmem (!%p187_p10), [#allocation2], %s391_s11  ;;  %s396_s21 = sshll.u32 (!%p187_p10), %s528_s15, 7 }
  0x11   : > { %s285_s19 = sshll.u32 (!%p187_p10), %s225_s18, 4  ;;  %s271_s28 = scalar_lea.sflag (!%p187_p10), [#allocation3], %s223_s10  ;;  %s627_s19 = int_to_ptr.vmem [resolvable:$true] %s285_s19 }
  0x12   : > { %s458_s29 = scalar_lea.vmem (!%p187_p10), %s627_s19, 128 }
  0x13   : > { %p459_p12 = scmp.ne.s32.totalorder (!%p187_p10), %s627_s19, %s458_s29 }
  0x15   : > { %p460_p13 = pnand (!%p187_p10), %p459_p12, %p599_p4 }
  0x16   : > { %s227_s26 = scalar_select %p226_p11, %s528_s15, 1 }
  0x17   : > { %p461_p0 = pneg %p460_p13  ;;  %s538_s15 = smov [#allocation2]  }
  0x18   : > { %s392_s27 = sshll.u32 %s227_s26, 3 }
  0x19   : > { %s232_s30 = scalar_lea.vmem %s677_s0, %s392_s27  ;;  %s239_s6 = scalar_lea.vmem %s678_s1, %s392_s27 }
  0x1a   : > { %s246_s9 = scalar_lea.vmem %s679_s2, %s392_s27  ;;  %v247_v0 = vld [vmem:[%s232_s30] sm:$0xff]  ;;  %s632_s27 = scalar_lea.hbm %s680_s3, %s396_s21 }
  0x1b   : > { %v248_v1 = vld [vmem:[%s239_s6] sm:$0xff]  ;;  %v252_v4 = vmul.f32 4.0, %v247_v0  ;;  %s462_s30 = sshll.u32 %s538_s15, 4  ;;  %s463_s30 = int_to_ptr.vmem [resolvable:$false] %s462_s30 }
  0x1c   : > { %v249_v2 = vld [vmem:[%s246_s9] sm:$0xff]  ;;  %v250_v3 = vadd.f32 %v248_v1, %v247_v0  ;;  %454 = vrcp.f32 %v248_v1  ;;  %vm267_vm2 = vcmp.gt.f32.partialorder %v248_v1, 0.0  ;;  %s464_s4 = scalar_lea.vmem %s463_s30, 256  ;;  %p465_p1 = scmp.lt.s32.totalorder %s627_s19, %s463_s30 }
  0x1d   : > { %v253_v6 = vmul.f32 %v252_v4, %v248_v1  ;;  %p466_p2 = scmp.lt.s32.totalorder %s464_s4, %s458_s29 }
  0x1e   : > { %v251_v5 = vsub.f32 %v250_v3, %v249_v2 }
  0x1f   : > { %p467_p3 = por %p466_p2, %p465_p1 }
  0x20   : > { %v254_v7 = vmul.f32 %v251_v5, %v251_v5 }
  0x21   : > { %p468_p5 = pnand %p467_p3, %p461_p0 }
  0x22   : > { %v255_v8 = vsub.f32 %v253_v6, %v254_v7 }
  0x24   : > { %v256_v9 = vmax.f32 %v255_v8, 0.0 }
  0x26   : > { %v455_v10 = vpop.eup %454 }
  0x27   : > { %v258_v11 = vmul.f32 %v455_v10, %v256_v9 }
  0x29   : > { %456 = vrsqrt.f32 %v258_v11  ;;  %vm261_vm0 = vcmp.eq.f32.partialorder %v258_v11, inf  ;;  %v264_v13 = vand.u32 2147483648, %v258_v11  ;;  %vm263_vm1 = vcmp.eq.f32.partialorder %v258_v11, 0.0 }
  0x33   : > { %v457_v12 = vpop.eup %456 }
  0x34   : > { %v260_v14 = vmul.f32 %v457_v12, %v258_v11 }
  0x36   : > { %v262_v15 = vsel %vm261_vm0, %v258_v11, %v260_v14 }
  0x37   : > { %v265_v16 = vsel %vm263_vm1, %v264_v13, %v262_v15 }
  0x38   : > { %v266_v17 = vmul.f32 0.5, %v265_v16 }
  0x3a   : > { %v268_v18 = vsel %vm267_vm2, %v266_v17, 0.0 }
  0x3b   : > { %269 = vst [vmem:[%s225_s18] sm:$0xff] %v268_v18 }
  0x3c   : > { %471 = shalt.err (!%p468_p5)
}
  0x3d   : > { %s472_s5 = scalar_lea.hbm %s632_s27, 128  ;;  %s476_s8 = scalar_lea.hbm %s680_s3, 256 }
  0x3e   : > { %p473_p6 = scmp.ne.s32.totalorder %s632_s27, %s472_s5  ;;  %p477_p10 = scmp.lt.u32.totalorder %s632_s27, %s680_s3 }
  0x3f   : > { %p478_p11 = scmp.lt.u32.totalorder %s476_s8, %s472_s5  ;;  %p480_p13 = scmp.lt.u32.totalorder %s472_s5, %s632_s27 }
  0x40   : > { %p474_p7 = pnand %p473_p6, %p599_p4 }
  0x41   : > { %p479_p12 = por %p478_p11, %p477_p10 }
  0x42   : > { %p475_p9 = pneg %p474_p7 }
  0x43   : > { %p481_p0 = por %p480_p13, %p479_p12 }
  0x45   : > { %p482_p1 = pnand %p481_p0, %p475_p9 }
  0x47   : > { %485 = shalt.err (!%p482_p1)
}
  0x48   : > { %399 = dma.vmem_to_hbm [thread:$0]  (%p599_p4), %s627_s19, 128, %s632_s27, %s271_s28  }
  0x49 PF: > { %p405_p2 = scmp.ge.s32.totalorder %s536_s17, 2  ;;  %s297_s11 = sand.u32 1, %s516_s12  }
  0x4a   : > { %s298_s18 = scalar_lea.sflag [#allocation3], %s297_s11 }
  0x4b   : > { %p402_p3 = pnand %p405_p2, %p606_p8 }
  0x4d   : > { %511 = dma.done.wait (!%p402_p3), %s298_s18, 128  }
  0x4e   : > { %513 = vsyncadd (!%p402_p3), %s298_s18, 4294967168  ;;  %s16_s17 = sadd.s32 1, %s536_s17   ;;  %s683_s12 = smov %s520_s13 }
  0x4f   : > { %p13_p5 = scmp.ge.s32.totalorder %s16_s17, 4   ;;  %s684_s13 = smov %s524_s14 }
  0x50   : > { %s685_s14 = smov %s612_s25  ;;  %s686_s15 = smov %s532_s16 }
  0x51   : > { %s687_s16 = smov %s689_s20  ;;  %15 = sbr.rel (!%p13_p5) target bundleno = 4 (0x4), region = 73 }
  0x58   :  { %303 = vsyncpa [#allocation3], 1 }
  0x59   :  { %305 = vsyncpa [#allocation3 + $0x1], 1 }

</bundles_post_ra>
